<compile_context>
chip_gen: v7x
topology: tpu7x:2x2x1
jax: 0.10.0
libtpu: 0.0.40
codegen_flags: <defaults>
</compile_context>

<pallas_src>
import jax
import jax.numpy as jnp
from jax import lax
from jax.experimental import pallas as pl
from jax.experimental.pallas import tpu as pltpu

EPS = 1e-5


def _embedding_kernel(x_ref, wb_ref, o_ref):
    """Full forward for one (B, D) problem.

    x_ref:  (B, D)        input activations
    wb_ref: (DEPTH, D+1, D)  rows 0..D-1: folded weight W' (in, out); row D: folded bias b'
    o_ref:  (B, D)        output
    """
    depth, d_in_p1, _ = wb_ref.shape
    d = d_in_p1 - 1

    x = x_ref[...].astype(jnp.float32)
    # Hoist ALL parameter reads: one load of the whole packed stack (~13 KB here).
    wb = wb_ref[...].astype(jnp.float32)

    # depth is a static shape attribute -> plain Python unroll with concrete
    # indices; every per-layer W'/b' access is a static slice of an in-vreg value.
    for layer in range(depth):
        w = wb[layer, :d, :]   # (D, D)
        b = wb[layer, d:, :]   # (1, D)

        # BatchNorm1d (training mode: batch statistics, biased variance).
        # E[x^2] - E[x]^2 keeps the two reductions independent.
        mean = jnp.mean(x, axis=0, keepdims=True)            # (1, D)
        mean_sq = jnp.mean(x * x, axis=0, keepdims=True)     # (1, D)
        var = mean_sq - mean * mean
        x_hat = (x - mean) * lax.rsqrt(var + EPS)

        # Linear with folded affine (+ folded bias) + ReLU; f32 MXU accumulation.
        z = jnp.dot(x_hat, w, preferred_element_type=jnp.float32) + b
        x = x + jnp.maximum(z, 0.0)                           # residual

    o_ref[...] = x.astype(o_ref.dtype)


def fold_params(w_stack, bias_stack, gamma_stack, beta_stack):
    """Fold the BatchNorm affine into the Linear and pack into one tensor.

    w_stack: (DEPTH, D, D) already (in, out); bias/gamma/beta: (DEPTH, D).
    Returns (DEPTH, D+1, D): rows 0..D-1 = gamma[:,None]*W, row D = beta @ W + bias.
    """
    w_folded = gamma_stack[:, :, None] * w_stack                        # (DEPTH, D, D)
    b_folded = jnp.einsum("dk,dkn->dn", beta_stack, w_stack) + bias_stack  # (DEPTH, D)
    return jnp.concatenate([w_folded, b_folded[:, None, :]], axis=1)    # (DEPTH, D+1, D)


@jax.jit
def embedding_forward(x, wb_stack):
    """Single problem: x (B, D), wb_stack (DEPTH, D+1, D)."""
    B, D = x.shape
    return pl.pallas_call(
        _embedding_kernel,
        out_shape=jax.ShapeDtypeStruct((B, D), x.dtype),
        # No grid: everything resident in VMEM; 2 input DMAs (x, packed params).
        in_specs=[
            pl.BlockSpec(memory_space=pltpu.MemorySpace.VMEM),  # x
            pl.BlockSpec(memory_space=pltpu.MemorySpace.VMEM),  # packed W'/b'
        ],
        out_specs=pl.BlockSpec(memory_space=pltpu.MemorySpace.VMEM),
    )(x, wb_stack)


@jax.jit
def embedding_forward_batched(xs, wb_stack):
    """N independent problems per pallas_call (amortizes launch cost).

    xs: (N, B, D) -- each (B, D) slice is an independent BatchNorm batch;
    the grid only shards over problem instances, never within one BN batch.
    """
    N, B, D = xs.shape
    depth, dp1, _ = wb_stack.shape
    return pl.pallas_call(
        _embedding_kernel,
        out_shape=jax.ShapeDtypeStruct((N, B, D), xs.dtype),
        grid=(N,),
        in_specs=[
            pl.BlockSpec((None, B, D), lambda n: (n, 0, 0)),         # one problem per step
            pl.BlockSpec((depth, dp1, D), lambda n: (0, 0, 0)),      # shared params, resident
        ],
        out_specs=pl.BlockSpec((None, B, D), lambda n: (n, 0, 0)),
        compiler_params=pltpu.CompilerParams(
            dimension_semantics=("parallel",)  # both TCs on v7x; harmless on v5e/v6e
        ),
    )(xs, wb_stack)


def embedding_reference(x, w_stack, bias_stack, gamma_stack, beta_stack):
    """Pure-JAX reference mirroring the PyTorch forward (unfolded params)."""
    xf = x.astype(jnp.float32)
    depth = w_stack.shape[0]
    for d in range(depth):
        mean = jnp.mean(xf, axis=0, keepdims=True)
        var = jnp.mean((xf - mean) ** 2, axis=0, keepdims=True)
        x_hat = (xf - mean) / jnp.sqrt(var + EPS)
        y = gamma_stack[d] * x_hat + beta_stack[d]
        z = y @ w_stack[d] + bias_stack[d]
        xf = xf + jnp.maximum(z, 0.0)
    return xf.astype(x.dtype)


if __name__ == "__main__":
    B = 8       # batch
    D = 32      # d_embedding
    DEPTH = 3   # depth

    key = jax.random.PRNGKey(0)
    kx, kw, kb, kg, kbe, kn = jax.random.split(key, 6)

    x = jax.random.normal(kx, (B, D), dtype=jnp.float32)

    # PyTorch Linear default init: U(-1/sqrt(in), 1/sqrt(in)); weights stored (in, out).
    bound = 1.0 / jnp.sqrt(jnp.float32(D))
    w_stack = jax.random.uniform(kw, (DEPTH, D, D), jnp.float32, -bound, bound)
    b_stack = jax.random.uniform(kb, (DEPTH, D), jnp.float32, -bound, bound)
    # Freshly-constructed BatchNorm1d would have gamma=1, beta=0; use non-trivial
    # values here so the affine-fold path is actually exercised and checked.
    gamma_stack = 1.0 + 0.5 * jax.random.normal(kg, (DEPTH, D), jnp.float32)
    beta_stack = 0.1 * jax.random.normal(kbe, (DEPTH, D), jnp.float32)

    # One-time XLA-side fold + pack -> single (DEPTH, D+1, D) param tensor.
    wb_stack = fold_params(w_stack, b_stack, gamma_stack, beta_stack)

    # --- single-problem path ---
    out = jax.block_until_ready(embedding_forward(x, wb_stack))
    ref = embedding_reference(x, w_stack, b_stack, gamma_stack, beta_stack)
    assert out.shape == (B, D)
    assert jnp.allclose(out, ref, atol=1e-4, rtol=1e-4), "single-problem mismatch vs reference"

    # --- batched (N independent problems per call) path ---
    N = 4
    xs = jax.random.normal(kn, (N, B, D), dtype=jnp.float32)
    outs = jax.block_until_ready(embedding_forward_batched(xs, wb_stack))
    refs = jnp.stack(
        [embedding_reference(xs[i], w_stack, b_stack, gamma_stack, beta_stack) for i in range(N)]
    )
    assert outs.shape == (N, B, D)
    assert jnp.allclose(outs, refs, atol=1e-4, rtol=1e-4), "batched mismatch vs reference"

    print("KERNEL_OK")
</pallas_src>

<mosaic_0001>
module attributes {stable_mosaic.version = 11 : i64} {
  func.func @_embedding_kernel(%arg0: memref<8x32xf32, #tpu.memory_space<vmem>>, %arg1: memref<3x33x32xf32, #tpu.memory_space<vmem>>, %arg2: memref<8x32xf32, #tpu.memory_space<vmem>>) attributes {dimension_semantics = [], scalar_prefetch = 0 : i64, scratch_operands = 0 : i64, tpu.core_type = #tpu.core_type<tc>} {
    %c0 = arith.constant 0 : index
    %c0_0 = arith.constant 0 : index
    %0 = vector.load %arg0[%c0, %c0_0] : memref<8x32xf32, #tpu.memory_space<vmem>>, vector<8x32xf32>
    %c0_1 = arith.constant 0 : index
    %c0_2 = arith.constant 0 : index
    %c0_3 = arith.constant 0 : index
    %1 = vector.load %arg1[%c0_1, %c0_2, %c0_3] : memref<3x33x32xf32, #tpu.memory_space<vmem>>, vector<3x33x32xf32>
    %2 = vector.extract_strided_slice %1 {offsets = [0, 0, 0], sizes = [1, 32, 32], strides = [1, 1, 1]} : vector<3x33x32xf32> to vector<1x32x32xf32>
    %3 = vector.shape_cast %2 : vector<1x32x32xf32> to vector<32x32xf32>
    %4 = vector.extract_strided_slice %1 {offsets = [0, 32, 0], sizes = [1, 1, 32], strides = [1, 1, 1]} : vector<3x33x32xf32> to vector<1x1x32xf32>
    %5 = vector.shape_cast %4 : vector<1x1x32xf32> to vector<1x32xf32>
    %cst = arith.constant dense<0.000000e+00> : vector<32xf32>
    %6 = vector.multi_reduction <add>, %0, %cst [0] : vector<8x32xf32> to vector<32xf32>
    %7 = vector.shape_cast %6 : vector<32xf32> to vector<1x32xf32>
    %cst_4 = arith.constant 8.000000e+00 : f32
    %8 = vector.broadcast %cst_4 : f32 to vector<1x32xf32>
    %9 = arith.divf %7, %8 : vector<1x32xf32>
    %10 = arith.mulf %0, %0 : vector<8x32xf32>
    %cst_5 = arith.constant dense<0.000000e+00> : vector<32xf32>
    %11 = vector.multi_reduction <add>, %10, %cst_5 [0] : vector<8x32xf32> to vector<32xf32>
    %12 = vector.shape_cast %11 : vector<32xf32> to vector<1x32xf32>
    %cst_6 = arith.constant 8.000000e+00 : f32
    %13 = vector.broadcast %cst_6 : f32 to vector<1x32xf32>
    %14 = arith.divf %12, %13 : vector<1x32xf32>
    %15 = arith.mulf %9, %9 : vector<1x32xf32>
    %16 = arith.subf %14, %15 : vector<1x32xf32>
    %17 = vector.broadcast %9 : vector<1x32xf32> to vector<8x32xf32>
    %18 = arith.subf %0, %17 : vector<8x32xf32>
    %cst_7 = arith.constant 9.99999974E-6 : f32
    %19 = vector.broadcast %cst_7 : f32 to vector<1x32xf32>
    %20 = arith.addf %16, %19 : vector<1x32xf32>
    %21 = math.rsqrt %20 : vector<1x32xf32>
    %22 = vector.broadcast %21 : vector<1x32xf32> to vector<8x32xf32>
    %23 = arith.mulf %18, %22 : vector<8x32xf32>
    %cst_8 = arith.constant dense<0.000000e+00> : vector<8x32xf32>
    %24 = tpu.matmul %23, %3, %cst_8 {dimension_numbers = #tpu.dot_dimension_numbers<[1], [0], [0], [1], [0, 0, 1, 1], [], []>} : vector<8x32xf32>, vector<32x32xf32>, vector<8x32xf32> -> vector<8x32xf32>
    %25 = vector.broadcast %5 : vector<1x32xf32> to vector<8x32xf32>
    %26 = arith.addf %24, %25 : vector<8x32xf32>
    %cst_9 = arith.constant 0.000000e+00 : f32
    %27 = vector.broadcast %cst_9 : f32 to vector<8x32xf32>
    %28 = arith.maximumf %26, %27 : vector<8x32xf32>
    %29 = arith.addf %0, %28 : vector<8x32xf32>
    %30 = vector.extract_strided_slice %1 {offsets = [1, 0, 0], sizes = [1, 32, 32], strides = [1, 1, 1]} : vector<3x33x32xf32> to vector<1x32x32xf32>
    %31 = vector.shape_cast %30 : vector<1x32x32xf32> to vector<32x32xf32>
    %32 = vector.extract_strided_slice %1 {offsets = [1, 32, 0], sizes = [1, 1, 32], strides = [1, 1, 1]} : vector<3x33x32xf32> to vector<1x1x32xf32>
    %33 = vector.shape_cast %32 : vector<1x1x32xf32> to vector<1x32xf32>
    %cst_10 = arith.constant dense<0.000000e+00> : vector<32xf32>
    %34 = vector.multi_reduction <add>, %29, %cst_10 [0] : vector<8x32xf32> to vector<32xf32>
    %35 = vector.shape_cast %34 : vector<32xf32> to vector<1x32xf32>
    %cst_11 = arith.constant 8.000000e+00 : f32
    %36 = vector.broadcast %cst_11 : f32 to vector<1x32xf32>
    %37 = arith.divf %35, %36 : vector<1x32xf32>
    %38 = arith.mulf %29, %29 : vector<8x32xf32>
    %cst_12 = arith.constant dense<0.000000e+00> : vector<32xf32>
    %39 = vector.multi_reduction <add>, %38, %cst_12 [0] : vector<8x32xf32> to vector<32xf32>
    %40 = vector.shape_cast %39 : vector<32xf32> to vector<1x32xf32>
    %cst_13 = arith.constant 8.000000e+00 : f32
    %41 = vector.broadcast %cst_13 : f32 to vector<1x32xf32>
    %42 = arith.divf %40, %41 : vector<1x32xf32>
    %43 = arith.mulf %37, %37 : vector<1x32xf32>
    %44 = arith.subf %42, %43 : vector<1x32xf32>
    %45 = vector.broadcast %37 : vector<1x32xf32> to vector<8x32xf32>
    %46 = arith.subf %29, %45 : vector<8x32xf32>
    %cst_14 = arith.constant 9.99999974E-6 : f32
    %47 = vector.broadcast %cst_14 : f32 to vector<1x32xf32>
    %48 = arith.addf %44, %47 : vector<1x32xf32>
    %49 = math.rsqrt %48 : vector<1x32xf32>
    %50 = vector.broadcast %49 : vector<1x32xf32> to vector<8x32xf32>
    %51 = arith.mulf %46, %50 : vector<8x32xf32>
    %cst_15 = arith.constant dense<0.000000e+00> : vector<8x32xf32>
    %52 = tpu.matmul %51, %31, %cst_15 {dimension_numbers = #tpu.dot_dimension_numbers<[1], [0], [0], [1], [0, 0, 1, 1], [], []>} : vector<8x32xf32>, vector<32x32xf32>, vector<8x32xf32> -> vector<8x32xf32>
    %53 = vector.broadcast %33 : vector<1x32xf32> to vector<8x32xf32>
    %54 = arith.addf %52, %53 : vector<8x32xf32>
    %cst_16 = arith.constant 0.000000e+00 : f32
    %55 = vector.broadcast %cst_16 : f32 to vector<8x32xf32>
    %56 = arith.maximumf %54, %55 : vector<8x32xf32>
    %57 = arith.addf %29, %56 : vector<8x32xf32>
    %58 = vector.extract_strided_slice %1 {offsets = [2, 0, 0], sizes = [1, 32, 32], strides = [1, 1, 1]} : vector<3x33x32xf32> to vector<1x32x32xf32>
    %59 = vector.shape_cast %58 : vector<1x32x32xf32> to vector<32x32xf32>
    %60 = vector.extract_strided_slice %1 {offsets = [2, 32, 0], sizes = [1, 1, 32], strides = [1, 1, 1]} : vector<3x33x32xf32> to vector<1x1x32xf32>
    %61 = vector.shape_cast %60 : vector<1x1x32xf32> to vector<1x32xf32>
    %cst_17 = arith.constant dense<0.000000e+00> : vector<32xf32>
    %62 = vector.multi_reduction <add>, %57, %cst_17 [0] : vector<8x32xf32> to vector<32xf32>
    %63 = vector.shape_cast %62 : vector<32xf32> to vector<1x32xf32>
    %cst_18 = arith.constant 8.000000e+00 : f32
    %64 = vector.broadcast %cst_18 : f32 to vector<1x32xf32>
    %65 = arith.divf %63, %64 : vector<1x32xf32>
    %66 = arith.mulf %57, %57 : vector<8x32xf32>
    %cst_19 = arith.constant dense<0.000000e+00> : vector<32xf32>
    %67 = vector.multi_reduction <add>, %66, %cst_19 [0] : vector<8x32xf32> to vector<32xf32>
    %68 = vector.shape_cast %67 : vector<32xf32> to vector<1x32xf32>
    %cst_20 = arith.constant 8.000000e+00 : f32
    %69 = vector.broadcast %cst_20 : f32 to vector<1x32xf32>
    %70 = arith.divf %68, %69 : vector<1x32xf32>
    %71 = arith.mulf %65, %65 : vector<1x32xf32>
    %72 = arith.subf %70, %71 : vector<1x32xf32>
    %73 = vector.broadcast %65 : vector<1x32xf32> to vector<8x32xf32>
    %74 = arith.subf %57, %73 : vector<8x32xf32>
    %cst_21 = arith.constant 9.99999974E-6 : f32
    %75 = vector.broadcast %cst_21 : f32 to vector<1x32xf32>
    %76 = arith.addf %72, %75 : vector<1x32xf32>
    %77 = math.rsqrt %76 : vector<1x32xf32>
    %78 = vector.broadcast %77 : vector<1x32xf32> to vector<8x32xf32>
    %79 = arith.mulf %74, %78 : vector<8x32xf32>
    %cst_22 = arith.constant dense<0.000000e+00> : vector<8x32xf32>
    %80 = tpu.matmul %79, %59, %cst_22 {dimension_numbers = #tpu.dot_dimension_numbers<[1], [0], [0], [1], [0, 0, 1, 1], [], []>} : vector<8x32xf32>, vector<32x32xf32>, vector<8x32xf32> -> vector<8x32xf32>
    %81 = vector.broadcast %61 : vector<1x32xf32> to vector<8x32xf32>
    %82 = arith.addf %80, %81 : vector<8x32xf32>
    %cst_23 = arith.constant 0.000000e+00 : f32
    %83 = vector.broadcast %cst_23 : f32 to vector<8x32xf32>
    %84 = arith.maximumf %82, %83 : vector<8x32xf32>
    %85 = arith.addf %57, %84 : vector<8x32xf32>
    %c0_24 = arith.constant 0 : index
    %c0_25 = arith.constant 0 : index
    %86 = vector.load %arg2[%c0_24, %c0_25] : memref<8x32xf32, #tpu.memory_space<vmem>>, vector<8x32xf32>
    tpu.vector_store %arg2[%c0_24, %c0_25], %85 {strides = array<i32>} : memref<8x32xf32, #tpu.memory_space<vmem>>, vector<8x32xf32>,
    return
  }
}

</mosaic_0001>

<bundles_post_ra>
// kernel: embedding_forward.1
= control target key start
LH: loop header
LB: loop body
LE: loop exit
PB: predicated region body
PF: predicated region fallthrough
CT: control target
= control target key end

     0   :  { %v457_v3 = vmov 0.0|0.0   ;;  %vm458_vm0 = vmmov 0   ;;  %v459_v6 = vmov 0.0   ;;  %vm28_vm1 = vcmask 261120   ;;  %s555_s0 = inlined_call_operand.vmem [shape: f32[8,32], index: 0, kind: input, shape index: {}]   ;;  %s556_s1 = inlined_call_operand.vmem [shape: f32[3,33,32], index: 1, kind: input, shape index: {}]   ;;  %s557_s2 = inlined_call_operand.hbm [shape: f32[8,32], index: 2, kind: output, shape index: {}]  }
   0x1   :  { %v13_v0 = vld [vmem:[%s556_s1] sm:$0xff]  ;;  %v14_v1 = vld [vmem:[%s556_s1 + $0x8] sm:$0xff]  ;;  %v15_v2 = vld [vmem:[%s556_s1 + $0x10] sm:$0xff]  ;;  %405 = vmatprep.subr.bf16.mxu0 %v457_v3  ;;  %380 = vmatprep.mubr.msk.f32.mxu0 %vm458_vm0, %v459_v6 }
   0x2   :  { %v406_v4 = vpack.c.bf16 %v14_v1, %v13_v0  ;;  %v16_v5 = vld [vmem:[%s556_s1 + $0x18] sm:$0xff]  ;;  %v12_v7 = vld [vmem:[%s555_s0] sm:$0xff]  ;;  %411 = vmatprep.subr.bf16.mxu1 %v457_v3  ;;  %391 = vmatprep.mubr.msk.f32.mxu1 %vm458_vm0, %v459_v6 }
   0x3   :  { %v29_v8 = vsel %vm28_vm1, %v12_v7, 0.0  ;;  %v38_v9 = vmul.f32 %v12_v7, %v12_v7 }
   0x4   :  { %7 = vsyncpa [#allocation3], 0  ;;  %407 = vmatpush3.bf16.msra.mxu0 %v406_v4  ;;  %v409_v10 = vpack.c.bf16 %v16_v5, %v15_v2  ;;  %v30_v11 = vrot.slane %v29_v8, 4  ;;  %v18_v32 = vld [vmem:[%s556_s1 + $0x28] sm:$0xff]  ;;  %v19_v33 = vld [vmem:[%s556_s1 + $0x30] sm:$0xff]  ;;  %s460_s12 = smov [#allocation2]  }
   0x5   :  { %408 = vmatprep.subr.bf16.mxu0 %v457_v3  ;;  %v39_v12 = vsel %vm28_vm1, %v38_v9, 0.0  ;;  %v20_v34 = vld [vmem:[%s556_s1 + $0x38] sm:$0xff]  ;;  %v412_v35 = vpack.c.bf16 %v19_v33, %v18_v32  ;;  %v21_v36 = vld [vmem:[%s556_s1 + $0x40] sm:$0xff]  ;;  %v23_v4 = vld [vmem:[%s556_s1 + $0x50] sm:$0xff]  ;;  %s343_s13 = sshll.u32 %s460_s12, 4  ;;  %s344_s13 = int_to_ptr.vmem [resolvable:$true] %s343_s13 }
   0x6   :  { %v31_v13 = vadd.f32 %v30_v11, %v29_v8  ;;  %v40_v14 = vrot.slane %v39_v12, 4  ;;  %v415_v37 = vpack.c.bf16 %v21_v36, %v20_v34  ;;  %v351_v38 = vld [vmem:[%s556_s1 + $0x20] ss:$0 sm:$0xff]  ;;  %v24_v5 = vld [vmem:[%s556_s1 + $0x58] sm:$0xff]  ;;  %v26_v8 = vld [vmem:[%s556_s1 + $0x68] sm:$0xff]  ;;  %s433_s14 = scalar_lea.vmem %s344_s13, 128  ;;  %p438_p1 = scmp.lt.s32.totalorder %s344_s13, %s344_s13 }
   0x7   :  { %413 = vmatpush3.bf16.msra.mxu1 %v412_v35  ;;  %p434_p0 = scmp.ne.s32.totalorder %s344_s13, %s433_s14  ;;  %p439_p2 = scmp.lt.s32.totalorder %s433_s14, %s433_s14 }
   0x8   :  { %410 = vmatpush3.bf16.msra.mxu0 %v409_v10  ;;  %v32_v15 = vrot.slane %v31_v13, 2  ;;  %v41_v16 = vadd.f32 %v40_v14, %v39_v12  ;;  %414 = vmatprep.subr.bf16.mxu1 %v457_v3  ;;  %v353_v10 = vld [vmem:[%s556_s1 + $0x48] ss:$0 sm:$0xff] }
   0x9   :  { %417 = vmatprep.subr.bf16.mxu0 %v457_v3  ;;  %p440_p3 = por %p439_p2, %p438_p1 }
   0xa   :  { %v33_v17 = vadd.f32 %v32_v15, %v31_v13  ;;  %v42_v18 = vrot.slane %v41_v16, 2 }
   0xb   :  { %416 = vmatpush3.bf16.msra.mxu1 %v415_v37  ;;  %p441_p4 = pnand %p440_p3, %p434_p0 }
   0xc   :  { %v34_v19 = vrot.slane %v33_v17, 1  ;;  %v43_v20 = vadd.f32 %v42_v18, %v41_v16 }
   0xe   :  { %v35_v21 = vadd.f32 %v34_v19, %v33_v17  ;;  %v44_v22 = vrot.slane %v43_v20, 1 }
  0x10   :  { %v37_v23 = vmul.f32 0.125, %v35_v21  ;;  %v45_v24 = vadd.f32 %v44_v22, %v43_v20 }
  0x12   :  { %v46_v25 = vmul.f32 0.125, %v45_v24  ;;  %v47_v26 = vmul.f32 %v37_v23, %v37_v23  ;;  %v49_v29 = vsub.f32 %v12_v7, %v37_v23 }
  0x14   :  { %v48_v27 = vsub.f32 %v46_v25, %v47_v26 }
  0x16   :  { %v50_v28 = vadd.f32 1e-05, %v48_v27 }
  0x18   :  { %427 = vrsqrt.f32 %v50_v28 }
  0x22   :  { %v428_v30 = vpop.eup %427 }
  0x23   :  { %v52_v31 = vmul.f32 %v428_v30, %v49_v29 }
  0x25   :  { %381 = vmatmul.mubr.msk.f32.vlgmr.msra.gmra.mrb[0].mxu0 %vm28_vm1, %v52_v31 }
  0x26   :  { %402 = vmatprep.mubr.msk.f32.mxu0 %vm458_vm0, %v459_v6  ;;  %v25_v6 = vld [vmem:[%s556_s1 + $0x60] sm:$0xff] }
  0x27   :  { %v421_v9 = vpack.c.bf16 %v26_v8, %v25_v6 }
  0xf8   :  { %v126_v39 = vpop.f32.mrb[0].mxu0 }
  0xf9   :  { %v127_v40 = vadd.f32 %v351_v38, %v126_v39  ;;  %v382_v41 = vpop.f32.mrb[1].mxu0  ;;  %v355_v38 = vld [vmem:[%s556_s1 + $0x70] ss:$0 sm:$0xff] }
  0xfb   :  { %v130_v42 = vmax.f32 %v127_v40, 0.0 }
  0xfd   :  { %v131_v43 = vadd.f32 %v130_v42, %v12_v7  ;;  %v418_v7 = vpack.c.bf16 %v24_v5, %v23_v4 }
  0xff   :  { %v132_v44 = vsel %vm28_vm1, %v131_v43, 0.0  ;;  %v140_v45 = vmul.f32 %v131_v43, %v131_v43  ;;  %419 = vmatpush3.bf16.msra.mxu0 %v418_v7 }
 0x100   :  { %v133_v46 = vrot.slane %v132_v44, 4  ;;  %420 = vmatprep.subr.bf16.mxu0 %v457_v3 }
 0x101   :  { %v141_v47 = vsel %vm28_vm1, %v140_v45, 0.0 }
 0x102   :  { %v134_v48 = vadd.f32 %v133_v46, %v132_v44  ;;  %v142_v49 = vrot.slane %v141_v47, 4 }
 0x103   :  { %422 = vmatpush3.bf16.msra.mxu0 %v421_v9 }
 0x104   :  { %v135_v50 = vrot.slane %v134_v48, 2  ;;  %v143_v51 = vadd.f32 %v142_v49, %v141_v47 }
 0x106   :  { %v144_v52 = vrot.slane %v143_v51, 2  ;;  %v136_v53 = vadd.f32 %v135_v50, %v134_v48 }
 0x108   :  { %v145_v54 = vadd.f32 %v144_v52, %v143_v51  ;;  %v137_v55 = vrot.slane %v136_v53, 1 }
 0x10a   :  { %v146_v56 = vrot.slane %v145_v54, 1  ;;  %v138_v57 = vadd.f32 %v137_v55, %v136_v53 }
 0x10c   :  { %v139_v58 = vmul.f32 0.125, %v138_v57  ;;  %v147_v59 = vadd.f32 %v146_v56, %v145_v54 }
 0x10e   :  { %v148_v60 = vmul.f32 0.125, %v147_v59  ;;  %v149_v61 = vmul.f32 %v139_v58, %v139_v58  ;;  %v151_v0 = vsub.f32 %v131_v43, %v139_v58 }
 0x110   :  { %v150_v62 = vsub.f32 %v148_v60, %v149_v61 }
 0x112   :  { %v152_v63 = vadd.f32 1e-05, %v150_v62 }
 0x114   :  { %429 = vrsqrt.f32 %v152_v63 }
 0x11e   :  { %v430_v1 = vpop.eup %429 }
 0x11f   :  { %v154_v2 = vmul.f32 %v430_v1, %v151_v0 }
 0x121   :  { %392 = vmatmul.mubr.msk.f32.vlgmr.msra.gmra.mrb[0].mxu1 %vm28_vm1, %v154_v2 }
 0x1f4   :  { %v228_v11 = vpop.f32.mrb[0].mxu1 }
 0x1f5   :  { %v229_v12 = vadd.f32 %v353_v10, %v228_v11  ;;  %v393_v13 = vpop.f32.mrb[1].mxu1 }
 0x1f7   :  { %v232_v14 = vmax.f32 %v229_v12, 0.0 }
 0x1f9   :  { %v233_v15 = vadd.f32 %v232_v14, %v131_v43 }
 0x1fb   :  { %v234_v16 = vsel %vm28_vm1, %v233_v15, 0.0  ;;  %v242_v17 = vmul.f32 %v233_v15, %v233_v15 }
 0x1fc   :  { %v235_v18 = vrot.slane %v234_v16, 4 }
 0x1fd   :  { %v243_v19 = vsel %vm28_vm1, %v242_v17, 0.0 }
 0x1fe   :  { %v236_v20 = vadd.f32 %v235_v18, %v234_v16  ;;  %v244_v21 = vrot.slane %v243_v19, 4 }
 0x200   :  { %v237_v22 = vrot.slane %v236_v20, 2  ;;  %v245_v3 = vadd.f32 %v244_v21, %v243_v19 }
 0x202   :  { %v238_v23 = vadd.f32 %v237_v22, %v236_v20  ;;  %v246_v24 = vrot.slane %v245_v3, 2 }
 0x204   :  { %v239_v25 = vrot.slane %v238_v23, 1  ;;  %v247_v26 = vadd.f32 %v246_v24, %v245_v3 }
 0x206   :  { %v240_v27 = vadd.f32 %v239_v25, %v238_v23  ;;  %v248_v28 = vrot.slane %v247_v26, 1 }
 0x208   :  { %v241_v29 = vmul.f32 0.125, %v240_v27  ;;  %v249_v30 = vadd.f32 %v248_v28, %v247_v26 }
 0x20a   :  { %v250_v31 = vmul.f32 0.125, %v249_v30  ;;  %v251_v32 = vmul.f32 %v241_v29, %v241_v29  ;;  %v253_v35 = vsub.f32 %v233_v15, %v241_v29 }
 0x20c   :  { %v252_v33 = vsub.f32 %v250_v31, %v251_v32 }
 0x20e   :  { %v254_v34 = vadd.f32 1e-05, %v252_v33 }
 0x210   :  { %431 = vrsqrt.f32 %v254_v34 }
 0x21a   :  { %v432_v36 = vpop.eup %431 }
 0x21b   :  { %v256_v37 = vmul.f32 %v432_v36, %v253_v35 }
 0x21d   :  { %403 = vmatmul.mubr.msk.f32.vlgmr.msra.gmra.mrb[2].mxu0 %vm28_vm1, %v256_v37 }
 0x2f0   :  { %v330_v39 = vpop.f32.mrb[2].mxu0 }
 0x2f1   :  { %v331_v40 = vadd.f32 %v355_v38, %v330_v39  ;;  %v404_v41 = vpop.f32.mrb[3].mxu0 }
 0x2f3   :  { %v334_v42 = vmax.f32 %v331_v40, 0.0 }
 0x2f5   :  { %v335_v43 = vadd.f32 %v334_v42, %v233_v15 }
 0x2f7   :  { %336 = vst.msk [vmem:[#allocation2] sm:$0xff] %vm28_vm1, %v335_v43 }
 0x2f8   :  { %444 = shalt.err (!%p441_p4)
}
 0x2f9   :  { %s445_s1 = scalar_lea.hbm %s557_s2, 128 }
 0x2fa   :  { %p446_p5 = scmp.ne.s32.totalorder %s557_s2, %s445_s1  ;;  %p449_p6 = scmp.lt.u32.totalorder %s445_s1, %s557_s2 }
 0x2fc   :  { %p451_p7 = pnand %p449_p6, %p446_p5 }
 0x2fe   :  { %454 = shalt.err (!%p451_p7)
}
 0x2ff   :  { %346 = dma.vmem_to_hbm [thread:$0]  %s344_s13, 128, %s557_s2, [#allocation3]  }
 0x300   :  { %455 = dma.done.wait [#allocation3], 128  }
 0x301   :  { %456 = vsyncadd [#allocation3], 4294967168 }
 0x302   :  { %350 = vsyncpa [#allocation3], 1 }

</bundles_post_ra>
